<compile_context>
chip_gen: v5e
topology: v5e:2x2
jax: 0.10.0
libtpu: 0.0.40
codegen_flags: <defaults>
</compile_context>

<pallas_src>
import functools

import jax
import jax.numpy as jnp
from jax.experimental import pallas as pl
from jax.experimental.pallas import tpu as pltpu

_SUB = 8      # sublanes per vreg
_LANE = 128   # lanes per vreg


def mlp_kernel(w1_ref, b1_ref, w2_ref, b2_ref, x_ref, o_ref, *, compute_dtype):
    """One batch tile of the MLP, batch packed on sublanes x lanes.

    x_ref : (16, bl) VMEM tile.  Rows 0..7 hold feature-0 (x0) for 8*bl
            samples, rows 8..15 hold feature-1 (x1) for the same samples.
    o_ref : (8, bl) VMEM tile (one sigmoid output per sample).
    w1_ref(2,4), b1_ref(4,), w2_ref(4,), b2_ref(1,) : SMEM parameters.
    """
    cd = compute_dtype
    x0 = x_ref[0:8, :].astype(cd)    # (8, bl), fully-occupied vregs
    x1 = x_ref[8:16, :].astype(cd)   # (8, bl)

    # Hoist the 13 SMEM scalar reads once, before the unrolled chain.
    w1v = [(w1_ref[0, j].astype(cd), w1_ref[1, j].astype(cd)) for j in range(4)]
    b1v = [b1_ref[j].astype(cd) for j in range(4)]
    w2v = [w2_ref[j].astype(cd) for j in range(4)]
    b2s = b2_ref[0].astype(cd)

    # h_j = relu(w1[0,j]*x0 + w1[1,j]*x1 + b1[j]);  z = sum_j w2[j]*h_j + b2
    acc = None
    for j in range(4):               # fully unrolled at trace time
        pre = w1v[j][0] * x0 + w1v[j][1] * x1 + b1v[j]
        h = jnp.maximum(pre, 0.0)
        term = w2v[j] * h
        acc = term if acc is None else acc + term
    z = acc + b2s

    # Sigmoid entirely on the EUP slot: exp + approximate reciprocal.
    e = jnp.exp(-z)
    y = pl.reciprocal(1.0 + e, approx=True)
    o_ref[...] = y.astype(o_ref.dtype)


def mlp_forward_packed(x_fm, w1, b1, w2, b2, *, block_lanes=65536,
                       compute_dtype=jnp.float32):
    """Fast path.  x_fm: (2, B) feature-major input.  Returns (B, 1).

    Only free reshapes are used for layout (a zero-pad is added only when
    B is not a multiple of 8*128 = 1024).  block_lanes controls the input
    bytes per grid step: 8*block_lanes samples / step (default ~4 MiB f32).
    """
    assert x_fm.shape[0] == 2, "expected feature-major (2, B) input"
    B = x_fm.shape[1]
    out_dtype = x_fm.dtype

    # Pad the batch to a multiple of 8*128 so the packed view is lane-aligned.
    gran = _SUB * _LANE
    Bp = pl.cdiv(B, gran) * gran
    if Bp != B:
        x_fm = jnp.pad(x_fm, ((0, 0), (0, Bp - B)))
    L = Bp // _SUB                                  # total lanes (multiple of 128)
    xp = x_fm.reshape(2 * _SUB, L)                  # free reshape: (16, L)

    # Lane tile size: multiple of 128, clamped to the problem size.
    bl = max(_LANE, min(int(block_lanes), L))
    bl = (bl // _LANE) * _LANE
    n_blocks = pl.cdiv(L, bl)

    in_bytes = 2 * _SUB * bl * xp.dtype.itemsize
    out_bytes = _SUB * bl * jnp.dtype(out_dtype).itemsize
    # Explicit scoped-VMEM limit: enough for double-buffered in+out, capped
    # below v7x's 64 MiB physical VMEM.
    vmem_limit = int(max(4 * 2**20, min(3 * (in_bytes + out_bytes), 48 * 2**20)))

    kernel = functools.partial(mlp_kernel, compute_dtype=compute_dtype)

    out_p = pl.pallas_call(
        kernel,
        out_shape=jax.ShapeDtypeStruct((_SUB, L), out_dtype),
        grid=(n_blocks,),
        in_specs=[
            pl.BlockSpec(memory_space=pltpu.MemorySpace.SMEM),   # w1 (2, 4)
            pl.BlockSpec(memory_space=pltpu.MemorySpace.SMEM),   # b1 (4,)
            pl.BlockSpec(memory_space=pltpu.MemorySpace.SMEM),   # w2 (4,)
            pl.BlockSpec(memory_space=pltpu.MemorySpace.SMEM),   # b2 (1,)
            pl.BlockSpec((2 * _SUB, bl), lambda i: (0, i)),      # packed batch tile
        ],
        out_specs=pl.BlockSpec((_SUB, bl), lambda i: (0, i)),
        compiler_params=pltpu.CompilerParams(
            dimension_semantics=("parallel",),      # lets v7x split across 2 TCs
            vmem_limit_bytes=vmem_limit,
        ),
    )(w1, b1, w2, b2, xp)

    # (8, L) -> (Bp,) in sample order (free reshape), drop padded samples.
    return out_p.reshape(Bp)[:B].reshape(B, 1)


def mlp_forward(x, w1, b1, w2, b2, **kwargs):
    """PyTorch-layout entry point: x (B, 2) -> (B, 1).

    NOTE: the x.T below is the only remaining extra HBM pass on this compat
    path; callers that control their data layout should pass feature-major
    (2, B) input to `mlp_forward_packed` and skip it entirely.
    """
    assert x.ndim == 2 and x.shape[1] == 2
    return mlp_forward_packed(x.T, w1, b1, w2, b2, **kwargs)


def init_params(key):
    # PyTorch Linear shapes: hidden.weight (4,2), hidden.bias (4); out.weight
    # (1,4), out.bias (1).  Stored pre-transposed: w1 (2,4), b1 (4,), w2 (4,),
    # b2 (1,).
    k1, k2, k3, k4 = jax.random.split(key, 4)
    w1 = jax.random.normal(k1, (2, 4), dtype=jnp.float32) * 0.5
    b1 = jax.random.normal(k2, (4,), dtype=jnp.float32) * 0.1
    w2 = jax.random.normal(k3, (4,), dtype=jnp.float32) * 0.5
    b2 = jax.random.normal(k4, (1,), dtype=jnp.float32) * 0.1
    return w1, b1, w2, b2


def mlp_ref(x, w1, b1, w2, b2):
    h = jnp.maximum(x @ w1 + b1, 0.0)
    z = h @ w2 + b2[0]
    return jax.nn.sigmoid(z)[:, None]


if __name__ == "__main__":
    key = jax.random.PRNGKey(0)
    kx, kp = jax.random.split(key)
    w1, b1, w2, b2 = init_params(kp)

    # (B, extra kwargs): tiny single block; pad path; multi-block parallel grid.
    checks = [
        (8, {}),
        (1000, {}),
        (4096, {"block_lanes": 128}),
    ]
    for B, kw in checks:
        x = jax.random.normal(jax.random.fold_in(kx, B), (B, 2), dtype=jnp.float32)
        out = jax.block_until_ready(mlp_forward(x, w1, b1, w2, b2, **kw))
        ref = mlp_ref(x, w1, b1, w2, b2)
        assert out.shape == (B, 1)
        err = float(jnp.max(jnp.abs(out - ref)))
        assert jnp.allclose(out, ref, atol=2e-3, rtol=2e-3), (B, err)

        # Also exercise the zero-relayout feature-major fast path directly.
        out2 = jax.block_until_ready(mlp_forward_packed(x.T, w1, b1, w2, b2, **kw))
        assert jnp.allclose(out2, ref, atol=2e-3, rtol=2e-3)

    print("KERNEL_OK")
</pallas_src>

<mosaic_0001>
module attributes {stable_mosaic.version = 11 : i64} {
  func.func @mlp_kernel(%arg0: i32, %arg1: memref<2x4xf32, #tpu.memory_space<smem>>, %arg2: memref<4xf32, #tpu.memory_space<smem>>, %arg3: memref<4xf32, #tpu.memory_space<smem>>, %arg4: memref<1xf32, #tpu.memory_space<smem>>, %arg5: memref<16x128xf32, #tpu.memory_space<vmem>>, %arg6: memref<8x128xf32, #tpu.memory_space<vmem>>) attributes {dimension_semantics = [#tpu.dimension_semantics<parallel>], iteration_bounds = array<i64: 1>, scalar_prefetch = 0 : i64, scratch_operands = 0 : i64, tpu.core_type = #tpu.core_type<tc>, window_params = [{transform_indices = @transform_0, window_bounds = array<i64: 2, 4>}, {transform_indices = @transform_1, window_bounds = array<i64: 4>}, {transform_indices = @transform_2, window_bounds = array<i64: 4>}, {transform_indices = @transform_3, window_bounds = array<i64: 1>}, {transform_indices = @transform_4, window_bounds = array<i64: 16, 128>}, {transform_indices = @transform_5, window_bounds = array<i64: 8, 128>}]} {
    %c0 = arith.constant 0 : index
    %c0_0 = arith.constant 0 : index
    %0 = vector.load %arg5[%c0, %c0_0] : memref<16x128xf32, #tpu.memory_space<vmem>>, vector<8x128xf32>
    %c8 = arith.constant 8 : index
    %c0_1 = arith.constant 0 : index
    %1 = vector.load %arg5[%c8, %c0_1] : memref<16x128xf32, #tpu.memory_space<vmem>>, vector<8x128xf32>
    %c0_2 = arith.constant 0 : index
    %c0_3 = arith.constant 0 : index
    %2 = memref.load %arg1[%c0_2, %c0_3] : memref<2x4xf32, #tpu.memory_space<smem>>
    %c1 = arith.constant 1 : index
    %c0_4 = arith.constant 0 : index
    %3 = memref.load %arg1[%c1, %c0_4] : memref<2x4xf32, #tpu.memory_space<smem>>
    %c0_5 = arith.constant 0 : index
    %c1_6 = arith.constant 1 : index
    %4 = memref.load %arg1[%c0_5, %c1_6] : memref<2x4xf32, #tpu.memory_space<smem>>
    %c1_7 = arith.constant 1 : index
    %c1_8 = arith.constant 1 : index
    %5 = memref.load %arg1[%c1_7, %c1_8] : memref<2x4xf32, #tpu.memory_space<smem>>
    %c0_9 = arith.constant 0 : index
    %c2 = arith.constant 2 : index
    %6 = memref.load %arg1[%c0_9, %c2] : memref<2x4xf32, #tpu.memory_space<smem>>
    %c1_10 = arith.constant 1 : index
    %c2_11 = arith.constant 2 : index
    %7 = memref.load %arg1[%c1_10, %c2_11] : memref<2x4xf32, #tpu.memory_space<smem>>
    %c0_12 = arith.constant 0 : index
    %c3 = arith.constant 3 : index
    %8 = memref.load %arg1[%c0_12, %c3] : memref<2x4xf32, #tpu.memory_space<smem>>
    %c1_13 = arith.constant 1 : index
    %c3_14 = arith.constant 3 : index
    %9 = memref.load %arg1[%c1_13, %c3_14] : memref<2x4xf32, #tpu.memory_space<smem>>
    %c0_15 = arith.constant 0 : index
    %10 = memref.load %arg2[%c0_15] : memref<4xf32, #tpu.memory_space<smem>>
    %c1_16 = arith.constant 1 : index
    %11 = memref.load %arg2[%c1_16] : memref<4xf32, #tpu.memory_space<smem>>
    %c2_17 = arith.constant 2 : index
    %12 = memref.load %arg2[%c2_17] : memref<4xf32, #tpu.memory_space<smem>>
    %c3_18 = arith.constant 3 : index
    %13 = memref.load %arg2[%c3_18] : memref<4xf32, #tpu.memory_space<smem>>
    %c0_19 = arith.constant 0 : index
    %14 = memref.load %arg3[%c0_19] : memref<4xf32, #tpu.memory_space<smem>>
    %c1_20 = arith.constant 1 : index
    %15 = memref.load %arg3[%c1_20] : memref<4xf32, #tpu.memory_space<smem>>
    %c2_21 = arith.constant 2 : index
    %16 = memref.load %arg3[%c2_21] : memref<4xf32, #tpu.memory_space<smem>>
    %c3_22 = arith.constant 3 : index
    %17 = memref.load %arg3[%c3_22] : memref<4xf32, #tpu.memory_space<smem>>
    %c0_23 = arith.constant 0 : index
    %18 = memref.load %arg4[%c0_23] : memref<1xf32, #tpu.memory_space<smem>>
    %19 = vector.broadcast %2 : f32 to vector<8x128xf32>
    %20 = arith.mulf %19, %0 : vector<8x128xf32>
    %21 = vector.broadcast %3 : f32 to vector<8x128xf32>
    %22 = arith.mulf %21, %1 : vector<8x128xf32>
    %23 = arith.addf %20, %22 : vector<8x128xf32>
    %24 = vector.broadcast %10 : f32 to vector<8x128xf32>
    %25 = arith.addf %23, %24 : vector<8x128xf32>
    %cst = arith.constant 0.000000e+00 : f32
    %26 = vector.broadcast %cst : f32 to vector<8x128xf32>
    %27 = arith.maximumf %25, %26 : vector<8x128xf32>
    %28 = vector.broadcast %14 : f32 to vector<8x128xf32>
    %29 = arith.mulf %28, %27 : vector<8x128xf32>
    %30 = vector.broadcast %4 : f32 to vector<8x128xf32>
    %31 = arith.mulf %30, %0 : vector<8x128xf32>
    %32 = vector.broadcast %5 : f32 to vector<8x128xf32>
    %33 = arith.mulf %32, %1 : vector<8x128xf32>
    %34 = arith.addf %31, %33 : vector<8x128xf32>
    %35 = vector.broadcast %11 : f32 to vector<8x128xf32>
    %36 = arith.addf %34, %35 : vector<8x128xf32>
    %cst_24 = arith.constant 0.000000e+00 : f32
    %37 = vector.broadcast %cst_24 : f32 to vector<8x128xf32>
    %38 = arith.maximumf %36, %37 : vector<8x128xf32>
    %39 = vector.broadcast %15 : f32 to vector<8x128xf32>
    %40 = arith.mulf %39, %38 : vector<8x128xf32>
    %41 = arith.addf %29, %40 : vector<8x128xf32>
    %42 = vector.broadcast %6 : f32 to vector<8x128xf32>
    %43 = arith.mulf %42, %0 : vector<8x128xf32>
    %44 = vector.broadcast %7 : f32 to vector<8x128xf32>
    %45 = arith.mulf %44, %1 : vector<8x128xf32>
    %46 = arith.addf %43, %45 : vector<8x128xf32>
    %47 = vector.broadcast %12 : f32 to vector<8x128xf32>
    %48 = arith.addf %46, %47 : vector<8x128xf32>
    %cst_25 = arith.constant 0.000000e+00 : f32
    %49 = vector.broadcast %cst_25 : f32 to vector<8x128xf32>
    %50 = arith.maximumf %48, %49 : vector<8x128xf32>
    %51 = vector.broadcast %16 : f32 to vector<8x128xf32>
    %52 = arith.mulf %51, %50 : vector<8x128xf32>
    %53 = arith.addf %41, %52 : vector<8x128xf32>
    %54 = vector.broadcast %8 : f32 to vector<8x128xf32>
    %55 = arith.mulf %54, %0 : vector<8x128xf32>
    %56 = vector.broadcast %9 : f32 to vector<8x128xf32>
    %57 = arith.mulf %56, %1 : vector<8x128xf32>
    %58 = arith.addf %55, %57 : vector<8x128xf32>
    %59 = vector.broadcast %13 : f32 to vector<8x128xf32>
    %60 = arith.addf %58, %59 : vector<8x128xf32>
    %cst_26 = arith.constant 0.000000e+00 : f32
    %61 = vector.broadcast %cst_26 : f32 to vector<8x128xf32>
    %62 = arith.maximumf %60, %61 : vector<8x128xf32>
    %63 = vector.broadcast %17 : f32 to vector<8x128xf32>
    %64 = arith.mulf %63, %62 : vector<8x128xf32>
    %65 = arith.addf %53, %64 : vector<8x128xf32>
    %66 = vector.broadcast %18 : f32 to vector<8x128xf32>
    %67 = arith.addf %65, %66 : vector<8x128xf32>
    %cst_27 = arith.constant 0.000000e+00 : f32
    %68 = vector.broadcast %cst_27 : f32 to vector<8x128xf32>
    %69 = arith.subf %68, %67 : vector<8x128xf32>
    %70 = math.exp %69 : vector<8x128xf32>
    %cst_28 = arith.constant 1.000000e+00 : f32
    %71 = vector.broadcast %cst_28 : f32 to vector<8x128xf32>
    %72 = arith.addf %71, %70 : vector<8x128xf32>
    %73 = tpu.reciprocal %72 {approx = true} : vector<8x128xf32> -> vector<8x128xf32>
    %c0_29 = arith.constant 0 : index
    %c0_30 = arith.constant 0 : index
    %74 = vector.load %arg6[%c0_29, %c0_30] : memref<8x128xf32, #tpu.memory_space<vmem>>, vector<8x128xf32>
    tpu.vector_store %arg6[%c0_29, %c0_30], %73 {strides = array<i32>} : memref<8x128xf32, #tpu.memory_space<vmem>>, vector<8x128xf32>,
    return
  }
  func.func @transform_0(%arg0: i32) -> (i32, i32) {
    %c0_i32 = arith.constant 0 : i32
    %c0_i32_0 = arith.constant 0 : i32
    %c0_i32_1 = arith.constant 0 : i32
    return %c0_i32, %c0_i32_0 : i32, i32
  }
  func.func @transform_1(%arg0: i32) -> i32 {
    %c0_i32 = arith.constant 0 : i32
    %c0_i32_0 = arith.constant 0 : i32
    return %c0_i32 : i32
  }
  func.func @transform_2(%arg0: i32) -> i32 {
    %c0_i32 = arith.constant 0 : i32
    %c0_i32_0 = arith.constant 0 : i32
    return %c0_i32 : i32
  }
  func.func @transform_3(%arg0: i32) -> i32 {
    %c0_i32 = arith.constant 0 : i32
    %c0_i32_0 = arith.constant 0 : i32
    return %c0_i32 : i32
  }
  func.func @transform_4(%arg0: i32) -> (i32, i32) {
    %c0_i32 = arith.constant 0 : i32
    %c0_i32_0 = arith.constant 0 : i32
    return %c0_i32, %arg0 : i32, i32
  }
  func.func @transform_5(%arg0: i32) -> (i32, i32) {
    %c0_i32 = arith.constant 0 : i32
    %c0_i32_0 = arith.constant 0 : i32
    return %c0_i32, %arg0 : i32, i32
  }
}

</mosaic_0001>

<bundles_post_ra>
// kernel: tpu_custom_call.1
= control target key start
LH: loop header
LB: loop body
LE: loop exit
PB: predicated region body
PF: predicated region fallthrough
CT: control target
= control target key end

     0   :  { %11 = vsyncpa [#allocation7], 0  ;;  %s338_s0 = inlined_call_operand.vmem [shape: f32[2,4], index: 0, kind: input, shape index: {}]   ;;  %s339_s1 = inlined_call_operand.hbm [shape: f32[4], index: 1, kind: input, shape index: {}]   ;;  %s340_s2 = inlined_call_operand.vmem [shape: f32[4], index: 2, kind: input, shape index: {}]   ;;  %s341_s3 = inlined_call_operand.<no memory space> [shape: f32[1], index: 3, kind: input, shape index: {}]   ;;  %s342_s4 = inlined_call_operand.hbm [shape: f32[16,128], index: 4, kind: input, shape index: {}]   ;;  %s343_s5 = inlined_call_operand.hbm [shape: f32[8,128], index: 5, kind: output, shape index: {}]  }
   0x1   :  { %12 = vsyncpa [#allocation6], 0 }
   0x2   :  { %13 = vsyncpa [#allocation10], 0 }
   0x3   :  { %14 = vsyncpa [#allocation4], 0 }
   0x4   :  { %15 = vsyncpa [#allocation5], 0  ;;  %s21_s20 = sshll.u32 %s338_s0, 4  ;;  %s30_s23 = sshll.u32 %s339_s1, 4  ;;  %s22_s20 = int_to_ptr.vmem [resolvable:$true] %s21_s20  ;;  %s31_s23 = int_to_ptr.hbm [resolvable:$true] %s30_s23 }
   0x5   :  { %s283_s24 = smov [#allocation3]   ;;  %s284_s25 = smov [#allocation8]  }
   0x6   :  { %24 = dma.vmem_to_smem %s22_s20, 32, %s283_s24, [#allocation7]  }
   0x7   :  { %33 = dma.hbm_to_smem %s31_s23, 16, %s284_s25, [#allocation6]  }
   0x8   :  { %s39_s28 = sshll.u32 %s340_s2, 4  ;;  %s49_s6 = sshll.u32 %s342_s4, 4  ;;  %s40_s28 = int_to_ptr.vmem [resolvable:$true] %s39_s28  ;;  %s50_s6 = int_to_ptr.hbm [resolvable:$true] %s49_s6 }
   0x9   :  { %s285_s0 = smov [#allocation9]   ;;  %s286_s7 = smov [#allocation11]  }
   0xa   :  { %42 = dma.vmem_to_smem %s40_s28, 16, %s285_s0, [#allocation10]  }
   0xb   :  { %s51_s8 = sshll.u32 %s286_s7, 4  ;;  %s287_s1 = smov 128   ;;  %s52_s8 = int_to_ptr.vmem [resolvable:$true] %s51_s8 }
   0xc   :  { %s288_s9 = smov 8  }
   0xd   :  { %57 = dma.hbm_to_vmem [thread:$0]  %s50_s6, 256, %s52_s8, [#allocation4], %s287_s1, %s287_s1, %s288_s9  }
   0xe   :  { %273 = dma.done.wait [#allocation7], 32  }
   0xf   :  { %274 = vsyncadd [#allocation7], 4294967264 }
  0x10   :  { %275 = dma.done.wait [#allocation6], 16  }
  0x11   :  { %276 = vsyncadd [#allocation6], 4294967280 }
  0x12   :  { %277 = dma.done.wait [#allocation10], 16  }
  0x13   :  { %278 = vsyncadd [#allocation10], 4294967280 }
  0x14   :  { %279 = dma.done.wait [#allocation4], 256  }
  0x15   :  { %280 = vsyncadd [#allocation4], 4294967040 }
  0x16   :  { %74 = sfence }
  0x17   :  { %s77_s2 = sld [smem:[#allocation3]]  ;;  %v75_v0 = vld [vmem:[#allocation11] sm:$0xff]  ;;  %v76_v1 = vld [vmem:[#allocation11 + $0x8] sm:$0xff]  ;;  %v137_v44 = vstv %s341_s3  ;;  %s289_s26 = smov [#allocation12]  }
  0x18   :  { %s165_s4 = sld [smem:[#allocation3 + $0x80]]  ;;  %s150_s27 = sshll.u32 %s289_s26, 4  ;;  %s151_s27 = int_to_ptr.vmem [resolvable:$true] %s150_s27 }
  0x19   :  { %s166_s10 = sld [smem:[#allocation3 + $0x1]]  ;;  %s152_s30 = sshll.u32 %s343_s5, 4  ;;  %s153_s30 = int_to_ptr.hbm [resolvable:$true] %s152_s30 }
  0x1a   :  { %s167_s11 = sld [smem:[#allocation3 + $0x81]] }
  0x1b   :  { %s168_s12 = sld [smem:[#allocation3 + $0x2]] }
  0x1c   :  { %s169_s13 = sld [smem:[#allocation3 + $0x82]] }
  0x1d   :  { %s170_s14 = sld [smem:[#allocation3 + $0x3]]  ;;  %v94_v2 = vstv %s77_s2 }
  0x1e   :  { %s171_s15 = sld [smem:[#allocation3 + $0x83]]  ;;  %v95_v3 = vmul.f32 %v94_v2, %v75_v0  ;;  %v96_v4 = vstv %s165_s4 }
  0x1f   :  { %s85_s16 = sld [smem:[#allocation8]]  ;;  %v97_v5 = vmul.f32 %v96_v4, %v76_v1  ;;  %v104_v6 = vstv %s166_s10 }
  0x20   :  { %s172_s17 = sld [smem:[#allocation8 + $0x1]]  ;;  %v105_v7 = vmul.f32 %v104_v6, %v75_v0  ;;  %v106_v8 = vstv %s167_s11 }
  0x21   :  { %s173_s18 = sld [smem:[#allocation8 + $0x2]]  ;;  %v107_v9 = vmul.f32 %v106_v8, %v76_v1  ;;  %v115_v10 = vstv %s168_s12  ;;  %v98_v11 = vadd.f32 %v97_v5, %v95_v3 }
  0x22   :  { %s174_s19 = sld [smem:[#allocation8 + $0x3]]  ;;  %v116_v12 = vmul.f32 %v115_v10, %v75_v0  ;;  %v117_v13 = vstv %s169_s13 }
  0x23   :  { %s89_s20 = sld [smem:[#allocation9]]  ;;  %v108_v14 = vadd.f32 %v107_v9, %v105_v7  ;;  %v118_v15 = vmul.f32 %v117_v13, %v76_v1  ;;  %v126_v16 = vstv %s170_s14 }
  0x24   :  { %s175_s21 = sld [smem:[#allocation9 + $0x1]]  ;;  %v127_v17 = vmul.f32 %v126_v16, %v75_v0  ;;  %v128_v18 = vstv %s171_s15 }
  0x25   :  { %s176_s22 = sld [smem:[#allocation9 + $0x2]]  ;;  %v99_v19 = vstv %s85_s16  ;;  %v119_v20 = vadd.f32 %v118_v15, %v116_v12  ;;  %v129_v21 = vmul.f32 %v128_v18, %v76_v1 }
  0x26   :  { %s177_s23 = sld [smem:[#allocation9 + $0x3]]  ;;  %v100_v22 = vadd.f32 %v99_v19, %v98_v11  ;;  %v109_v23 = vstv %s172_s17 }
  0x27   :  { %v110_v24 = vadd.f32 %v109_v23, %v108_v14  ;;  %v120_v25 = vstv %s173_s18  ;;  %v130_v26 = vadd.f32 %v129_v21, %v127_v17 }
  0x28   :  { %v101_v27 = vmax.f32 %v100_v22, 0.0  ;;  %v121_v28 = vadd.f32 %v120_v25, %v119_v20  ;;  %v131_v29 = vstv %s174_s19 }
  0x29   :  { %v102_v30 = vstv %s89_s20  ;;  %v111_v31 = vmax.f32 %v110_v24, 0.0  ;;  %v132_v32 = vadd.f32 %v131_v29, %v130_v26 }
  0x2a   :  { %v103_v33 = vmul.f32 %v102_v30, %v101_v27  ;;  %v112_v34 = vstv %s175_s21  ;;  %v122_v35 = vmax.f32 %v121_v28, 0.0 }
  0x2b   :  { %v113_v36 = vmul.f32 %v112_v34, %v111_v31  ;;  %v123_v37 = vstv %s176_s22  ;;  %v133_v38 = vmax.f32 %v132_v32, 0.0 }
  0x2c   :  { %v124_v39 = vmul.f32 %v123_v37, %v122_v35  ;;  %v134_v40 = vstv %s177_s23 }
  0x2d   :  { %v114_v41 = vadd.f32 %v113_v36, %v103_v33  ;;  %v135_v42 = vmul.f32 %v134_v40, %v133_v38 }
  0x2f   :  { %v125_v43 = vadd.f32 %v124_v39, %v114_v41 }
  0x31   :  { %v136_v45 = vadd.f32 %v135_v42, %v125_v43 }
  0x33   :  { %v138_v46 = vadd.f32 %v137_v44, %v136_v45 }
  0x35   :  { %v139_v47 = vsub.f32 0.0, %v138_v46 }
  0x37   :  { %v140_v48 = vmul.f32 1.442695, %v139_v47 }
  0x39   :  { %185 = vpow2.f32 %v140_v48 }
  0x3f   :  { %v186_v49 = vpop.eup %185 }
  0x40   :  { %v142_v50 = vadd.f32 1.0, %v186_v49 }
  0x42   :  { %187 = vrcp.f32 %v142_v50 }
  0x48   :  { %v188_v51 = vpop.eup %187 }
  0x49   :  { %144 = vst [vmem:[#allocation12] sm:$0xff] %v188_v51 }
  0x4a   :  { %155 = dma.vmem_to_hbm [thread:$0]  %s151_s27, 128, %s153_s30, [#allocation5]  }
  0x4b   :  { %281 = dma.done.wait [#allocation5], 128  }
  0x4c   :  { %282 = vsyncadd [#allocation5], 4294967168 }
  0x4d   :  { %160 = vsyncpa [#allocation4], 1 }
  0x4e   :  { %161 = vsyncpa [#allocation5], 1 }
  0x4f   :  { %162 = vsyncpa [#allocation6], 1 }
  0x50   :  { %163 = vsyncpa [#allocation7], 1 }
  0x51   :  { %164 = vsyncpa [#allocation10], 1 }

</bundles_post_ra>
